<compile_context>
chip_gen: v6e
topology: v6e:2x2x1
jax: 0.10.0
libtpu: 0.0.40
codegen_flags: <defaults>
</compile_context>

<pallas_src>
import jax
import jax.numpy as jnp
from jax.experimental import pallas as pl
from jax.experimental.pallas import tpu as pltpu

_SUBLANE = 8
_LANE = 128


def _round_up(n, m):
    return ((n + m - 1) // m) * m


def _cdiv(a, b):
    return -(-a // b)


def _budgets():
    """(x_tile_bytes, vmem_limit_bytes) tuned per TPU generation."""
    vmem_phys = 64 * 1024 * 1024          # conservative fallback (v7x per-core VMEM)
    try:
        info = pltpu.get_tpu_info()
        vmem_phys = int(getattr(info, "vmem_capacity_bytes", vmem_phys)) or vmem_phys
    except Exception:
        pass
    # ~48 MiB on v7x (64 MiB physical), 96 MiB on v5e/v6e (128 MiB physical).
    vmem_limit = min((vmem_phys * 3) // 4, 96 * 1024 * 1024)
    # Double-buffered x stays <= vmem_limit / 2; weight/output/scratch are tiny.
    x_tile_bytes = min(16 * 1024 * 1024, vmem_limit // 4)
    return x_tile_bytes, vmem_limit


def _choose_tiles(B, F, itemsize, x_tile_bytes):
    """Pick (TB, TF, n_b, n_f).  TF = F (full extent) whenever it fits the budget."""
    b8 = _round_up(B, _SUBLANE)
    b128 = _round_up(B, _LANE)

    # Feature tiling: full-extent last dim is exempt from the 128 rule.
    min_rows = min(_LANE, b8)
    if F * min_rows * itemsize <= x_tile_bytes:
        tf = F
    else:
        tf = max(_LANE, (x_tile_bytes // (min_rows * itemsize)) // _LANE * _LANE)
    n_f = _cdiv(F, tf)

    # Batch tiling.
    if n_f == 1 and B * F * itemsize <= x_tile_bytes and b8 < 2 * _LANE:
        tb = B                      # one full-extent tile: no padding, no partial blocks
    elif n_f > 1 and b8 * tf * itemsize <= x_tile_bytes and b8 < 2 * _LANE:
        tb = b8                     # one sublane-rounded batch tile, features blocked
    else:
        # Fill the budget (no artificial cap), 128-lane multiples for the
        # lane-dense output blocks; never exceed what the batch needs.
        tb = (x_tile_bytes // (tf * itemsize)) // _LANE * _LANE
        tb = max(_LANE, min(tb, b128))
        if tb >= b128 and b128 >= 2 * _LANE:
            # Megacore (v7x has 2 TCs): guarantee at least two batch tiles.
            tb = _round_up(_cdiv(b128, 2), _LANE)
    n_b = _cdiv(B, tb)
    return tb, tf, n_b, n_f


def _logreg_kernel_1pass(x_ref, w_ref, b_ref, o_ref):
    # x_ref: (TB, F) VMEM; w_ref: (1, F) VMEM; b_ref: (1,) SMEM; o_ref: (1, TB) VMEM.
    x = x_ref[...].astype(jnp.float32)
    w = w_ref[...].astype(jnp.float32)
    # GEMV as VPU multiply + single XLU lane-reduce; one sublane->lane relayout.
    z = jnp.sum(x * w, axis=-1)[None, :] + b_ref[0]
    # Exact sigmoid (keeps 1e-5 tolerance); exp/recip issue on the EUP.
    o_ref[...] = pl.reciprocal(1.0 + jnp.exp(-z), approx=False).astype(o_ref.dtype)


def _make_logreg_kernel_blocked(F, tf, mask_tail):
    def kernel(x_ref, w_ref, b_ref, o_ref, acc_ref):
        # x_ref: (TB, TF) VMEM; w_ref: (1, TF) VMEM; b_ref: (1,) SMEM;
        # o_ref: (1, TB) VMEM; acc_ref: (TB, 1) f32 VMEM scratch (sublane layout).
        j = pl.program_id(1)

        @pl.when(j == 0)
        def _init():
            acc_ref[...] = jnp.zeros_like(acc_ref)

        p = x_ref[...].astype(jnp.float32) * w_ref[...].astype(jnp.float32)
        if mask_tail:
            # x/w are NOT padded along F: zero contributions from out-of-range
            # columns of the (possibly partial) last feature block.
            col = jax.lax.broadcasted_iota(jnp.int32, p.shape, 1) + j * tf
            p = jnp.where(col < F, p, 0.0)
        # Hot loop: VPU multiply + lane-reduce into a sublane-layout accumulator;
        # the sublane->lane relayout is hoisted to the finalize block.
        acc_ref[...] += jnp.sum(p, axis=-1, keepdims=True)

        @pl.when(j == pl.num_programs(1) - 1)
        def _finalize():
            z = acc_ref[...][:, 0][None, :] + b_ref[0]        # (1, TB), lane-dense
            o_ref[...] = pl.reciprocal(1.0 + jnp.exp(-z), approx=False).astype(o_ref.dtype)

    return kernel


def logistic_regression(x, weight, bias):
    """x: (B, F); weight: (1, F) (PyTorch nn.Linear layout); bias: (1,). Returns (B, 1)."""
    B, F = x.shape
    itemsize = jnp.dtype(x.dtype).itemsize
    x_tile_bytes, vmem_limit = _budgets()
    tb, tf, n_b, n_f = _choose_tiles(B, F, itemsize, x_tile_bytes)

    w2 = weight.reshape(1, F)
    b1 = bias.reshape(1)

    cost = pl.CostEstimate(
        flops=2 * B * F,
        transcendentals=B,
        bytes_accessed=itemsize * (B * F + F + B + 1),
    )

    if n_f == 1:
        out = pl.pallas_call(
            _logreg_kernel_1pass,
            out_shape=jax.ShapeDtypeStruct((1, n_b * tb), x.dtype),
            grid_spec=pltpu.PrefetchScalarGridSpec(
                num_scalar_prefetch=0,
                grid=(n_b,),
                in_specs=[
                    pl.BlockSpec((tb, F), lambda i: (i, 0)),                 # x tile
                    pl.BlockSpec((1, F), lambda i: (0, 0)),                  # lane-dense weight
                    pl.BlockSpec(memory_space=pltpu.MemorySpace.SMEM),       # bias scalar
                ],
                out_specs=pl.BlockSpec((1, tb), lambda i: (0, i)),           # lane-dense slab
            ),
            compiler_params=pltpu.CompilerParams(
                dimension_semantics=("parallel",),
                vmem_limit_bytes=vmem_limit,
            ),
            cost_estimate=cost,
        )(x, w2, b1)
    else:
        kernel = _make_logreg_kernel_blocked(F, tf, mask_tail=(F % tf != 0))
        out = pl.pallas_call(
            kernel,
            out_shape=jax.ShapeDtypeStruct((1, n_b * tb), x.dtype),
            grid_spec=pltpu.PrefetchScalarGridSpec(
                num_scalar_prefetch=0,
                grid=(n_b, n_f),                                             # reduction axis last
                in_specs=[
                    pl.BlockSpec((tb, tf), lambda i, j: (i, j)),             # x tile
                    pl.BlockSpec((1, tf), lambda i, j: (0, j)),              # lane-dense weight
                    pl.BlockSpec(memory_space=pltpu.MemorySpace.SMEM),       # bias scalar
                ],
                out_specs=pl.BlockSpec((1, tb), lambda i, j: (0, i)),        # lane-dense slab
                scratch_shapes=[pltpu.VMEM((tb, 1), jnp.float32)],
            ),
            compiler_params=pltpu.CompilerParams(
                dimension_semantics=("parallel", "arbitrary"),
                vmem_limit_bytes=vmem_limit,
            ),
            cost_estimate=cost,
        )(x, w2, b1)

    # Lane-dense (1, n_b*TB) slab -> (B, 1) column expected by the module.
    return out.reshape(n_b * tb, 1)[:B]


def logistic_regression_ref(x, weight, bias):
    return jax.nn.sigmoid(x @ weight.T + bias)


if __name__ == "__main__":
    key = jax.random.PRNGKey(0)
    kx, kw, kb = jax.random.split(key, 3)

    batch = 8
    n_features = 32

    x = jax.random.normal(kx, (batch, n_features), dtype=jnp.float32)
    # Deterministic parameter init (synthetic, mimics nn.Linear(n_features, 1))
    bound = 1.0 / jnp.sqrt(n_features)
    weight = jax.random.uniform(
        kw, (1, n_features), minval=-bound, maxval=bound, dtype=jnp.float32
    )
    bias = jax.random.uniform(
        kb, (1,), minval=-bound, maxval=bound, dtype=jnp.float32
    )

    y = logistic_regression(x, weight, bias)
    y = jax.block_until_ready(y)

    y_ref = logistic_regression_ref(x, weight, bias)
    assert y.shape == (batch, 1)
    assert jnp.allclose(y, y_ref, atol=1e-5, rtol=1e-5)

    print("KERNEL_OK")
</pallas_src>

<mosaic_0001>
module attributes {stable_mosaic.version = 11 : i64} {
  func.func @_logreg_kernel_1pass(%arg0: i32, %arg1: memref<8x32xf32, #tpu.memory_space<vmem>>, %arg2: memref<1x32xf32, #tpu.memory_space<vmem>>, %arg3: memref<1xf32, #tpu.memory_space<smem>>, %arg4: memref<1x8xf32, #tpu.memory_space<vmem>>) attributes {dimension_semantics = [#tpu.dimension_semantics<parallel>], iteration_bounds = array<i64: 1>, scalar_prefetch = 0 : i64, scratch_operands = 0 : i64, tpu.core_type = #tpu.core_type<tc>, window_params = [{transform_indices = @transform_0, window_bounds = array<i64: 8, 32>}, {pipeline_mode = #tpu.pipeline_mode<synchronous>, transform_indices = @transform_1, window_bounds = array<i64: 1, 32>}, {transform_indices = @transform_2, window_bounds = array<i64: 1>}, {transform_indices = @transform_3, window_bounds = array<i64: 1, 8>}]} {
    %c0 = arith.constant 0 : index
    %c0_0 = arith.constant 0 : index
    %0 = vector.load %arg1[%c0, %c0_0] : memref<8x32xf32, #tpu.memory_space<vmem>>, vector<8x32xf32>
    %c0_1 = arith.constant 0 : index
    %c0_2 = arith.constant 0 : index
    %1 = vector.load %arg2[%c0_1, %c0_2] : memref<1x32xf32, #tpu.memory_space<vmem>>, vector<1x32xf32>
    %2 = vector.broadcast %1 : vector<1x32xf32> to vector<8x32xf32>
    %3 = arith.mulf %0, %2 : vector<8x32xf32>
    %cst = arith.constant dense<0.000000e+00> : vector<8xf32>
    %4 = vector.multi_reduction <add>, %3, %cst [1] : vector<8x32xf32> to vector<8xf32>
    %5 = vector.shape_cast %4 : vector<8xf32> to vector<1x8xf32>
    %c0_3 = arith.constant 0 : index
    %6 = memref.load %arg3[%c0_3] : memref<1xf32, #tpu.memory_space<smem>>
    %7 = vector.broadcast %6 : f32 to vector<1x8xf32>
    %8 = arith.addf %5, %7 : vector<1x8xf32>
    %cst_4 = arith.constant 0.000000e+00 : f32
    %9 = vector.broadcast %cst_4 : f32 to vector<1x8xf32>
    %10 = arith.subf %9, %8 : vector<1x8xf32>
    %11 = math.exp %10 : vector<1x8xf32>
    %cst_5 = arith.constant 1.000000e+00 : f32
    %12 = vector.broadcast %cst_5 : f32 to vector<1x8xf32>
    %13 = arith.addf %12, %11 : vector<1x8xf32>
    %14 = tpu.reciprocal %13 : vector<1x8xf32> -> vector<1x8xf32>
    %c0_6 = arith.constant 0 : index
    %c0_7 = arith.constant 0 : index
    %15 = vector.load %arg4[%c0_6, %c0_7] : memref<1x8xf32, #tpu.memory_space<vmem>>, vector<1x8xf32>
    tpu.vector_store %arg4[%c0_6, %c0_7], %14 {strides = array<i32>} : memref<1x8xf32, #tpu.memory_space<vmem>>, vector<1x8xf32>,
    return
  }
  func.func @transform_0(%arg0: i32) -> (i32, i32) {
    %c0_i32 = arith.constant 0 : i32
    %c0_i32_0 = arith.constant 0 : i32
    return %arg0, %c0_i32 : i32, i32
  }
  func.func @transform_1(%arg0: i32) -> (i32, i32) {
    %c0_i32 = arith.constant 0 : i32
    %c0_i32_0 = arith.constant 0 : i32
    %c0_i32_1 = arith.constant 0 : i32
    return %c0_i32, %c0_i32_0 : i32, i32
  }
  func.func @transform_2(%arg0: i32) -> i32 {
    %c0_i32 = arith.constant 0 : i32
    %c0_i32_0 = arith.constant 0 : i32
    return %c0_i32 : i32
  }
  func.func @transform_3(%arg0: i32) -> (i32, i32) {
    %c0_i32 = arith.constant 0 : i32
    %c0_i32_0 = arith.constant 0 : i32
    return %c0_i32, %arg0 : i32, i32
  }
}

</mosaic_0001>

<bundles_post_ra>
// kernel: tpu_custom_call.1
= control target key start
LH: loop header
LB: loop body
LE: loop exit
PB: predicated region body
PF: predicated region fallthrough
CT: control target
= control target key end

     0   :  { %9 = vsyncpa [#allocation4], 0  ;;  %s159_s0 = inlined_call_operand.hbm [shape: f32[8,32], index: 0, kind: input, shape index: {}]   ;;  %s160_s1 = inlined_call_operand.vmem [shape: f32[1,32], index: 1, kind: input, shape index: {}]   ;;  %s161_s2 = inlined_call_operand.<no memory space> [shape: f32[1], index: 2, kind: input, shape index: {}]   ;;  %s162_s3 = inlined_call_operand.hbm [shape: f32[1,8], index: 3, kind: output, shape index: {}]  }
   0x1   :  { %10 = vsyncpa [#allocation5], 0  ;;  %s125_s12 = smov [#allocation3]  }
   0x2   :  { %s17_s13 = sshll.u32 %s125_s12, 4  ;;  %s18_s13 = int_to_ptr.vmem [resolvable:$true] %s17_s13 }
   0x3   :  { %s89_s14 = scalar_lea.vmem %s18_s13, 128  ;;  %p94_p1 = scmp.lt.s32.totalorder %s18_s13, %s18_s13 }
   0x4   :  { %p90_p0 = scmp.ne.s32.totalorder %s18_s13, %s89_s14  ;;  %p95_p2 = scmp.lt.s32.totalorder %s89_s14, %s89_s14 }
   0x6   :  { %p96_p3 = por %p95_p2, %p94_p1 }
   0x8   :  { %p97_p4 = pnand %p96_p3, %p90_p0 }
   0xa   :  { %100 = shalt.err (!%p97_p4)
}
   0xb   :  { %20 = dma.hbm_to_vmem [thread:$0]  %s159_s0, 128, %s18_s13, [#allocation4]  }
   0xc   :  { %121 = dma.done.wait [#allocation4], 128  }
   0xd   :  { %122 = vsyncadd [#allocation4], 4294967168  ;;  %v28_v0 = vld [vmem:[#allocation3] sm:$0xff]  ;;  %vm37_vm0 = vcmask 261120   ;;  %v42_v4 = vstv %s161_s2  ;;  %v50_v11 = vlaneseq  ;;  %s126_s0 = smov [#allocation6]   ;;  %vm57_vm1 = vcmask 57344  }
   0xe   :  { %v74_v1 = vld [vmem:[%s160_s1] ss:$0 sm:$0xff]  ;;  %s65_s1 = sshll.u32 %s126_s0, 4  ;;  %s66_s1 = int_to_ptr.vmem [resolvable:$true] %s65_s1 }
   0xf   :  { %v36_v2 = vmul.f32 %v74_v1, %v28_v0  ;;  %v51_v12 = vand.u32 127, %v50_v11  ;;  %v53_v13 = vshrl.u32 %v50_v11, 7  ;;  %s101_s2 = scalar_lea.vmem %s66_s1, 16  ;;  %s105_s21 = scalar_lea.vmem %s66_s1, 32 }
  0x10   :  { %p102_p5 = scmp.ne.s32.totalorder %s66_s1, %s101_s2  ;;  %p106_p6 = scmp.lt.s32.totalorder %s66_s1, %s66_s1 }
  0x11   :  { %v38_v3 = vsel %vm37_vm0, %v36_v2, 0.0  ;;  %v54_v14 = vsub.s32 %v51_v12, %v53_v13  ;;  %p107_p7 = scmp.lt.s32.totalorder %s105_s21, %s101_s2 }
  0x12   :  { %39 = vadd.xlane.f32.xlu0 %v38_v3 }
  0x13   :  { %p108_p8 = por %p107_p7, %p106_p6 }
  0x15   :  { %p109_p9 = pnand %p108_p8, %p102_p5 }
  0x9b   :  { %v40_v5 = vpop.xlane.xlu0 %39 }
  0x9c   :  { %v43_v6 = vadd.f32 %v42_v4, %v40_v5 }
  0x9e   :  { %v44_v7 = vsub.f32 0.0, %v43_v6 }
  0xa0   :  { %v45_v8 = vmul.f32 1.442695, %v44_v7 }
  0xa2   :  { %77 = vpow2.f32 %v45_v8 }
  0xaf   :  { %v78_v9 = vpop.eup %77 }
  0xb0   :  { %v47_v10 = vadd.f32 1.0, %v78_v9 }
  0xb2   :  { %79 = vrcp.f32 %v47_v10 }
  0xbf   :  { %v80_v15 = vpop.eup %79 }
  0xc0   :  { %v55_v16 = vrot.slane %v80_v15, %v54_v14 }
  0xc2   :  { %58 = vst.msk [vmem:[#allocation6] sm:$0x1] %vm57_vm1, %v55_v16 }
  0xc3   :  { %112 = shalt.err (!%p109_p9)
}
  0xc4   :  { %68 = dma.vmem_to_hbm [thread:$0]  %s66_s1, 16, %s162_s3, [#allocation5]  }
  0xc5   :  { %123 = dma.done.wait [#allocation5], 16  }
  0xc6   :  { %124 = vsyncadd [#allocation5], 4294967280 }
  0xc7   :  { %72 = vsyncpa [#allocation4], 1 }
  0xc8   :  { %73 = vsyncpa [#allocation5], 1 }

</bundles_post_ra>
